<compile_context>
chip_gen: v7x
topology: tpu7x:2x2x1
jax: 0.10.0
libtpu: 0.0.40
codegen_flags: <defaults>
</compile_context>

<pallas_src>
import jax
import jax.numpy as jnp
from jax.experimental import pallas as pl
from jax.experimental.pallas import tpu as pltpu


def _round_up(x, m):
    return ((x + m - 1) // m) * m


def _cdiv(a, b):
    return (a + b - 1) // b


def _choose_seq_tile(n, batch, target=256):
    """Pick (ts, n_pad): seq-tile length (multiple of 8) and padded seq length.

    n_pad is a multiple of ts, so every block obeys the (8, 128) rule and the
    old ts=N fallback is never needed.  The tile shrinks (down to 8) only when
    the grid would otherwise not have enough parallel steps for 2 TCs (v7x).
    """
    n8 = _round_up(max(n, 1), 8)
    ts = min(_round_up(target, 8), n8)
    while ts > 8 and batch * _cdiv(n8, ts) < 4:
        ts = _round_up(ts // 2, 8)
    return ts, _round_up(n8, ts)


def vit_patch_embed_kernel(patches_ref, w_ref, posb_ref, out_ref):
    # patches_ref: (1, ts, P)    bf16 patch rows of one batch element
    # w_ref:       (P, Hd_pad)   bf16 projection weight (grid-invariant)
    # posb_ref:    (ts, Hd_pad)  f32 pos-emb + bias for this seq tile
    # out_ref:     (ts, Hd_pad)  seq-first output slab (row-block si, col-block bi)
    acc = jnp.dot(patches_ref[0], w_ref[...],
                  preferred_element_type=jnp.float32)         # MXU, f32 acc
    out_ref[...] = (acc + posb_ref[...]).astype(out_ref.dtype)


def vit_embeddings(pixel_values, w, b, cls_token, pos_emb, patch_size):
    """ViTEmbeddings_ forward.

    pixel_values: (B, C, H, W) NCHW image batch.
    w:            (P, Hd) patch projection weight, rows in einops (p1 p2 c) order.
    b:            (1, Hd) patch projection bias.
    cls_token:    (1, Hd).
    pos_emb:      (1 + N, Hd) position embeddings (cls row first).
    Returns (1 + N, B, Hd) seq-first embeddings (== embeddings.transpose(0, 1)).
    """
    B, C, H_img, W_img = pixel_values.shape
    p = patch_size
    h, w_n = H_img // p, W_img // p
    N = h * w_n
    P = p * p * C
    Hd = w.shape[1]
    out_dtype = w.dtype    # bf16 params -> bf16 output (halves writeback bytes)

    # Patchify.  Semantically equal to einops
    #   'b c (h p1) (w p2) -> b (h w) (p1 p2 c)'
    # but laid out as (c p1 p2) so the innermost pixel dim (p2) stays
    # contiguous; the weight rows are permuted once below to match.
    # bf16 cast feeds the MXU; with allow_input_fusion XLA may fold this
    # rearrange straight into the kernel's input DMA (no HBM intermediate).
    patches = (pixel_values
               .reshape(B, C, h, p, w_n, p)
               .transpose(0, 2, 4, 1, 3, 5)               # (B, h, w, C, p1, p2)
               .reshape(B, N, P)
               .astype(jnp.bfloat16))
    # (p1 p2 c) row order -> (c p1 p2) row order.
    w_k = (w.reshape(p, p, C, Hd).transpose(2, 0, 1, 3).reshape(P, Hd)
           .astype(jnp.bfloat16))

    # Fold the bias into the patch-row position embeddings.  Kept f32 (full
    # precision epilogue); with the seq-outer grid it is read once per tile,
    # so its HBM traffic is negligible.  The cls row never enters the kernel.
    pos_bias = pos_emb[1:, :].astype(jnp.float32) + b.astype(jnp.float32)

    # Lane-dense output: pad the hidden dim to a multiple of 128 (no-op for
    # standard ViT widths 768/1024/1280, so the post-kernel slice never fires).
    Hd_pad = _round_up(Hd, 128)
    if Hd_pad != Hd:
        w_k = jnp.pad(w_k, ((0, 0), (0, Hd_pad - Hd)))
        pos_bias = jnp.pad(pos_bias, ((0, 0), (0, Hd_pad - Hd)))

    # Pad the patch-row axis up to a multiple of the seq tile.
    ts, N_pad = _choose_seq_tile(N, B)
    if N_pad != N:
        patches = jnp.pad(patches, ((0, 0), (0, N_pad - N), (0, 0)))
        pos_bias = jnp.pad(pos_bias, ((0, N_pad - N), (0, 0)))
    n_seq = N_pad // ts

    patch_out = pl.pallas_call(
        vit_patch_embed_kernel,
        out_shape=jax.ShapeDtypeStruct((N_pad, B * Hd_pad), out_dtype),
        grid_spec=pltpu.PrefetchScalarGridSpec(
            num_scalar_prefetch=0,
            # seq-tile outer, batch inner: the pos_bias / weight block indices
            # are constant across the inner (batch) steps -> fetched once per tile.
            grid=(n_seq, B),
            in_specs=[
                pl.BlockSpec((1, ts, P), lambda si, bi: (bi, si, 0)),
                pl.BlockSpec((P, Hd_pad), lambda si, bi: (0, 0)),
                pl.BlockSpec((ts, Hd_pad), lambda si, bi: (si, 0)),
            ],
            # Seq-first output written directly: (ts, Hd_pad) block at row si,
            # col-block bi of a (N_pad, B*Hd_pad) slab.  The reshape below to
            # (N_pad, B, Hd_pad) is a free row-major view -> no transpose pass.
            out_specs=pl.BlockSpec((ts, Hd_pad), lambda si, bi: (si, bi)),
        ),
        compiler_params=pltpu.CompilerParams(
            dimension_semantics=("parallel", "parallel"),
            # Allow XLA to fuse the patchify producer into operand 0's DMA.
            allow_input_fusion=[True, False, False],
            vmem_limit_bytes=32 * 1024 * 1024),
    )(patches, w_k, pos_bias)

    patch_out = patch_out.reshape(N_pad, B, Hd_pad)
    if N_pad != N or Hd_pad != Hd:
        patch_out = patch_out[:N, :, :Hd]

    # cls row: cls_token + pos_emb[0]  (identical for every batch element).
    cls_row = (cls_token.astype(jnp.float32)
               + pos_emb[0:1, :].astype(jnp.float32)).astype(out_dtype)
    cls_rows = jnp.broadcast_to(cls_row[:, None, :], (1, B, Hd))

    # Assemble seq-first (1+N, B, Hd) == embeddings.transpose(0, 1).
    # TODO(synk): hidden_dropout omitted (identity in eval / p = 0).
    return jnp.concatenate([cls_rows, patch_out], axis=0)


if __name__ == "__main__":
    # Small ViT-like config consistent with the module's forward.
    B, C, IMG, PATCH, HIDDEN = 2, 4, 16, 8, 32
    N = (IMG // PATCH) * (IMG // PATCH)      # 4 patches
    P = PATCH * PATCH * C                    # 256 flattened patch dim

    key = jax.random.PRNGKey(0)
    k_px, k_w, k_b, k_cls, k_pos = jax.random.split(key, 5)

    pixel_values = jax.random.normal(k_px, (B, C, IMG, IMG), dtype=jnp.float32)
    # Patch projection weight stored as (P, HIDDEN), rows in (p1 p2 c) order
    # (the einops-flattened-input convention of the PyTorch Linear).
    w = jax.random.normal(k_w, (P, HIDDEN), dtype=jnp.float32) * 0.02
    b = jax.random.normal(k_b, (1, HIDDEN), dtype=jnp.float32) * 0.02
    cls_token = jax.random.normal(k_cls, (1, HIDDEN), dtype=jnp.float32) * 0.02
    pos_emb = jax.random.normal(k_pos, (1 + N, HIDDEN), dtype=jnp.float32) * 0.02

    fn = jax.jit(vit_embeddings, static_argnums=(5,))
    out = jax.block_until_ready(fn(pixel_values, w, b, cls_token, pos_emb, PATCH))
    assert out.shape == (1 + N, B, HIDDEN), out.shape

    # Pure-JAX f32 reference (einops '(p1 p2 c)' patch order, original weight).
    patches_ref = (pixel_values
                   .reshape(B, C, IMG // PATCH, PATCH, IMG // PATCH, PATCH)
                   .transpose(0, 2, 4, 3, 5, 1)
                   .reshape(B, N, P))
    emb_ref = patches_ref @ w + b[None, :, :]                 # (B, N, H)
    cls_ref = jnp.broadcast_to(cls_token[None], (B, 1, HIDDEN))
    full_ref = jnp.concatenate([cls_ref, emb_ref], axis=1) + pos_emb[None]
    full_ref = jnp.transpose(full_ref, (1, 0, 2))

    # Matmul operands run in bf16 (f32 accumulate) inside the kernel, so
    # compare against the f32 reference with a bf16-appropriate tolerance.
    max_err = float(jnp.max(jnp.abs(out - full_ref)))
    assert jnp.allclose(out, full_ref, atol=5e-2, rtol=5e-2), max_err

    print("KERNEL_OK")
</pallas_src>

<mosaic_0001>
module attributes {stable_mosaic.version = 11 : i64} {
  func.func @vit_patch_embed_kernel(%arg0: i32, %arg1: i32, %arg2: memref<1x8x256xbf16, #tpu.memory_space<vmem>>, %arg3: memref<256x128xbf16, #tpu.memory_space<vmem>>, %arg4: memref<8x128xf32, #tpu.memory_space<vmem>>, %arg5: memref<8x128xf32, #tpu.memory_space<vmem>>) attributes {dimension_semantics = [#tpu.dimension_semantics<parallel>, #tpu.dimension_semantics<parallel>], iteration_bounds = array<i64: 1, 2>, scalar_prefetch = 0 : i64, scratch_operands = 0 : i64, tpu.core_type = #tpu.core_type<tc>, window_params = [{transform_indices = @transform_0, window_bounds = array<i64: 1, 8, 256>}, {pipeline_mode = #tpu.pipeline_mode<synchronous>, transform_indices = @transform_1, window_bounds = array<i64: 256, 128>}, {transform_indices = @transform_2, window_bounds = array<i64: 8, 128>}, {transform_indices = @transform_3, window_bounds = array<i64: 8, 128>}]} {
    %c0 = arith.constant 0 : index
    %c0_0 = arith.constant 0 : index
    %c0_1 = arith.constant 0 : index
    %0 = vector.load %arg2[%c0, %c0_0, %c0_1] : memref<1x8x256xbf16, #tpu.memory_space<vmem>>, vector<1x8x256xbf16>
    %1 = vector.shape_cast %0 : vector<1x8x256xbf16> to vector<8x256xbf16>
    %c0_2 = arith.constant 0 : index
    %c0_3 = arith.constant 0 : index
    %2 = vector.load %arg3[%c0_2, %c0_3] : memref<256x128xbf16, #tpu.memory_space<vmem>>, vector<256x128xbf16>
    %cst = arith.constant dense<0.000000e+00> : vector<8x128xf32>
    %3 = tpu.matmul %1, %2, %cst {dimension_numbers = #tpu.dot_dimension_numbers<[1], [0], [0], [1], [0, 0, 1, 1], [], []>} : vector<8x256xbf16>, vector<256x128xbf16>, vector<8x128xf32> -> vector<8x128xf32>
    %c0_4 = arith.constant 0 : index
    %c0_5 = arith.constant 0 : index
    %4 = vector.load %arg4[%c0_4, %c0_5] : memref<8x128xf32, #tpu.memory_space<vmem>>, vector<8x128xf32>
    %5 = arith.addf %3, %4 : vector<8x128xf32>
    %c0_6 = arith.constant 0 : index
    %c0_7 = arith.constant 0 : index
    %6 = vector.load %arg5[%c0_6, %c0_7] : memref<8x128xf32, #tpu.memory_space<vmem>>, vector<8x128xf32>
    tpu.vector_store %arg5[%c0_6, %c0_7], %5 {strides = array<i32>} : memref<8x128xf32, #tpu.memory_space<vmem>>, vector<8x128xf32>,
    return
  }
  func.func @transform_0(%arg0: i32, %arg1: i32) -> (i32, i32, i32) {
    %c0_i32 = arith.constant 0 : i32
    %c0_i32_0 = arith.constant 0 : i32
    return %arg1, %arg0, %c0_i32 : i32, i32, i32
  }
  func.func @transform_1(%arg0: i32, %arg1: i32) -> (i32, i32) {
    %c0_i32 = arith.constant 0 : i32
    %c0_i32_0 = arith.constant 0 : i32
    %c0_i32_1 = arith.constant 0 : i32
    return %c0_i32, %c0_i32_0 : i32, i32
  }
  func.func @transform_2(%arg0: i32, %arg1: i32) -> (i32, i32) {
    %c0_i32 = arith.constant 0 : i32
    %c0_i32_0 = arith.constant 0 : i32
    return %arg0, %c0_i32 : i32, i32
  }
  func.func @transform_3(%arg0: i32, %arg1: i32) -> (i32, i32) {
    %c0_i32 = arith.constant 0 : i32
    return %arg0, %arg1 : i32, i32
  }
}

</mosaic_0001>

<bundles_post_ra>
// kernel: vit_embeddings.2
= control target key start
LH: loop header
LB: loop body
LE: loop exit
PB: predicated region body
PF: predicated region fallthrough
CT: control target
= control target key end

     0   :  { %s731_s17 = smov 0   ;;  %s733_s18 = smov 0   ;;  %s821_s0 = inlined_call_operand.vmem [shape: bf16[256,128], index: 0, kind: input, shape index: {}]   ;;  %s822_s1 = inlined_call_operand.vmem [shape: f32[8,128], index: 1, kind: input, shape index: {}]   ;;  %s823_s2 = inlined_call_operand.vmem [shape: bf16[2,4,256], index: 2, kind: input, shape index: {}]   ;;  %s824_s3 = inlined_call_operand.<no memory space> [shape: bf16[], index: 3, kind: input, shape index: {}]   ;;  %s825_s4 = inlined_call_operand.vmem [shape: f32[8,256], index: 4, kind: output, shape index: {}]  }
   0x1   :  { %v9_v0 = vstv %s824_s3  ;;  %s735_s19 = smov 0  }
   0x2   :  { %v729_v1 = vunpack.i.l.bf16 %v9_v0 }
   0x3 LB: > { %s28_s3 = sadd.s32 1, %s694_s18  ;;  %p585_p0 = scmp.ge.s32.totalorder %s698_s19, 1  ;;  %s698_s19 = sphi %s735_s19, %s19_s19   ;;  %s694_s18 = sphi %s733_s18, %s827_s18   ;;  %s690_s17 = sphi %s731_s17, %s826_s17  }
   0x4   : > { %p29_p1 = scmp.ge.s32.totalorder %s28_s3, 2  ;;  %p178_p2 = scmp.lt.s32.totalorder %s698_s19, 3 }
   0x6   : > { %s829_s3 = smov (%p29_p1, %s28_s3), 0  ;;  %p179_p3 = pnand %p585_p0, %p178_p2 }
   0x8   : > { %182 = sbr.rel (%p179_p3) target bundleno = 266 (0x10a), region = 32 }
   0xf   : > { %v658_v2 = vld [vmem:[%s821_s0 + $0x40] sm:$0xff]   ;;  %v660_v4 = vld [vmem:[%s821_s0 + $0x48] sm:$0xff]   ;;  %p219_p4 = scmp.lt.s32.totalorder %s690_s17, 1  ;;  %v662_v6 = vld [vmem:[%s821_s0 + $0x50] sm:$0xff]   ;;  %v261_v9 = vlaneseq  ;;  %v700_v23 = vmov 0.0  }
  0x10   : > { %v659_v3 = vld [vmem:[%s821_s0] sm:$0xff]   ;;  %611 = vmatprep.subr.bf16.mxu0 %v658_v2  ;;  %v661_v5 = vld [vmem:[%s821_s0 + $0x8] sm:$0xff]   ;;  %v663_v7 = vld [vmem:[%s821_s0 + $0x10] sm:$0xff]  }
  0x11   : > { %612 = vmatpush3.bf16.msra.mxu0 %v659_v3  ;;  %s831_s17 = smov (!%p219_p4, %s690_s17), 1  ;;  %v664_v8 = vld [vmem:[%s821_s0 + $0x58] sm:$0xff]   ;;  %v666_v11 = vld [vmem:[%s821_s0 + $0x60] sm:$0xff]   ;;  %v262_v12 = vshrl.u32 %v261_v9, 7  ;;  %v668_v14 = vld [vmem:[%s821_s0 + $0x68] sm:$0xff]  }
  0x12   : > { %613 = vmatprep.subr.bf16.mxu0 %v660_v4  ;;  %s610_s8 = sshll.u32 %s831_s17, 2  ;;  %v665_v10 = vld [vmem:[%s821_s0 + $0x18] sm:$0xff]   ;;  %v667_v13 = vld [vmem:[%s821_s0 + $0x20] sm:$0xff]   ;;  %v669_v19 = vld [vmem:[%s821_s0 + $0x28] sm:$0xff]   ;;  %s588_s7 = sshll.u32 %s831_s17, 3 }
  0x13   : > { %s227_s15 = scalar_lea.vmem %s823_s2, %s610_s8  ;;  %vm265_vm0 = vcmp.lt.s32.totalorder %v262_v12, 4  ;;  %v670_v22 = vld [vmem:[%s821_s0 + $0x70] sm:$0xff]   ;;  %v672_v27 = vld [vmem:[%s821_s0 + $0x78] sm:$0xff]   ;;  %v333_v33 = vld [vmem:[%s822_s1] sm:$0xff]  ;;  %s242_s12 = scalar_lea.vmem %s825_s4, %s588_s7 }
  0x14   : > { %v253_v15 = vld [vmem:[%s227_s15] sm:$0x3]  ;;  %v589_v16 = vld [vmem:[%s227_s15 + $0x2] sm:$0x3]  ;;  %v671_v26 = vld [vmem:[%s821_s0 + $0x30] sm:$0xff]  }
  0x15   : > { %614 = vmatpush3.bf16.msra.mxu0 %v661_v5  ;;  %v254_v17 = vunpack.c.l.bf16 %v253_v15  ;;  %v282_v18 = vunpack.c.l.bf16 %v589_v16  ;;  %v673_v28 = vld [vmem:[%s821_s0 + $0x38] sm:$0xff]  }
  0x16   : > { %615 = vmatprep.subr.bf16.mxu0 %v662_v6 }
  0x17   : > { %v266_v20 = vsel %vm265_vm0, %v254_v17, %v729_v1  ;;  %v294_v21 = vsel %vm265_vm0, %v282_v18, %v729_v1 }
  0x18   : > { %v267_v24 = vpack.c.bf16 %v700_v23, %v266_v20  ;;  %v296_v25 = vpack.c.bf16 %v700_v23, %v294_v21 }
  0x19   : > { %616 = vmatpush3.bf16.msra.mxu0 %v663_v7 }
  0x1a   : > { %617 = vmatprep.subr.bf16.mxu0 %v664_v8  ;;  %269 = vst [vmem:[#allocation7] sm:$0xf] %v267_v24  ;;  %298 = vst [vmem:[#allocation7 + $0x4] sm:$0xf] %v296_v25 }
  0x1d   : > { %618 = vmatpush3.bf16.msra.mxu0 %v665_v10 }
  0x1e   : > { %619 = vmatprep.subr.bf16.mxu0 %v666_v11 }
  0x21   : > { %620 = vmatpush3.bf16.msra.mxu0 %v667_v13  ;;  %v300_v29 = vld [vmem:[#allocation7] sm:$0xff] }
  0x22   : > { %621 = vmatprep.subr.bf16.mxu0 %v668_v14  ;;  %v590_v30 = vcombine.low %v300_v29, %v300_v29  ;;  %v591_v31 = vcombine.high %v300_v29, %v300_v29 }
  0x24   : > { %469 = vmatprep.mubr.bf16.mxu0 %v591_v31 }
  0x25   : > { %622 = vmatpush3.bf16.msra.mxu0 %v669_v19 }
  0x26   : > { %623 = vmatprep.subr.bf16.mxu0 %v670_v22 }
  0x29   : > { %624 = vmatpush3.bf16.msra.mxu0 %v671_v26 }
  0x2a   : > { %625 = vmatprep.subr.bf16.mxu0 %v672_v27 }
  0x2d   : > { %626 = vmatpush3.bf16.msra.mxu0 %v673_v28 }
  0x30   : > { %470 = vmatmul.mubr.bf16.vlgmr.msra.gmra.mrb[0].mxu0 %v590_v30 }
 0x103   : > { %v627_v32 = vpop.f32.mrb[0].mxu0 }
 0x104   : > { %v628_v34 = vpop.f32.mrb[1].mxu0 }
 0x105   : > { %v629_v35 = vadd.f32 %v628_v34, %v627_v32  ;;  %v630_v36 = vpop.f32.mrb[2].mxu0 }
 0x106   : > { %v631_v37 = vpop.f32.mrb[3].mxu0 }
 0x107   : > { %v472_v38 = vadd.f32 %v629_v35, %v333_v33 }
 0x109   : > { %477 = vst [vmem:[%s242_s12] sm:$0xff] %v472_v38 }
 0x10a PF: > { %s19_s19 = sadd.s32 1, %s698_s19   ;;  %s826_s17 = smov %s694_s18 }
 0x10b   : > { %p16_p5 = scmp.ge.s32.totalorder %s19_s19, 4   ;;  %s827_s18 = smov %s829_s3 }
 0x10d   :  { %18 = sbr.rel (!%p16_p5) target bundleno = 3 (0x3), region = 67 }

</bundles_post_ra>
